<compile_context>
chip_gen: v7x
topology: tpu7x:2x2x1
jax: 0.10.0
libtpu: 0.0.40
codegen_flags: <defaults>
</compile_context>

<pallas_src>
import numpy as np
import jax
import jax.numpy as jnp
from jax.experimental import pallas as pl
from jax.experimental.pallas import tpu as pltpu


ROW_TILE = 512   # TM: output-row tile of the grad/MLP kernel
K_TILE = 512     # TK: contraction (vertex) tile streamed per step


def _tile_and_pad(n):
    """Return (padded_n, tm, tk). Small meshes use a single full-size block."""
    if n <= max(ROW_TILE, K_TILE):
        return n, n, n
    step = int(np.lcm(ROW_TILE, K_TILE))
    padded = ((n + step - 1) // step) * step
    return padded, ROW_TILE, K_TILE


# ----------------------------------------------------------------------------
# Pointwise linear (first_lin / last_lin), tiled over rows
# ----------------------------------------------------------------------------

def _linear_kernel(x_ref, w_ref, b_ref, o_ref):
    o_ref[0] = (jnp.dot(x_ref[0], w_ref[...], preferred_element_type=jnp.float32)
                + b_ref[...]).astype(o_ref.dtype)


def linear(x, w, b, tm):
    """x: [B,Np,Cin], w: [Cin,Cout], b: [1,Cout] -> [B,Np,Cout]."""
    B, Np, Cin = x.shape
    Cout = w.shape[1]
    return pl.pallas_call(
        _linear_kernel,
        out_shape=jax.ShapeDtypeStruct((B, Np, Cout), jnp.float32),
        grid_spec=pltpu.PrefetchScalarGridSpec(
            num_scalar_prefetch=0,
            grid=(B, Np // tm),
            in_specs=[
                pl.BlockSpec((1, tm, Cin), lambda b, n: (b, n, 0)),
                pl.BlockSpec((Cin, Cout), lambda b, n: (0, 0)),
                pl.BlockSpec((1, Cout), lambda b, n: (0, 0)),
            ],
            out_specs=pl.BlockSpec((1, tm, Cout), lambda b, n: (b, n, 0)),
        ),
        compiler_params=pltpu.CompilerParams(
            dimension_semantics=("parallel", "parallel")),
    )(x, w, b)


# ----------------------------------------------------------------------------
# LearnedTimeDiffusion, spectral: to-basis reduction over vertex tiles.
# Output is the already-scaled spectral coefficient block
#   spec[b] = exp(-evals * t) * (evecs[b]^T @ (x[b] * mass[b]))   (K, C)
# The from-basis expansion is fused into the grad/MLP kernel.
# ----------------------------------------------------------------------------

def _to_basis_kernel(x_ref, mass_ref, evt_ref, evals_ref, t_ref, o_ref, acc_ref):
    n = pl.program_id(1)

    @pl.when(n == 0)
    def _():
        acc_ref[...] = jnp.zeros_like(acc_ref)

    xm = (x_ref[0] * mass_ref[0]).astype(jnp.bfloat16)               # (tm, C)
    # evecs^T tile is lane-dense (K, tm): plain matmul, no in-kernel transpose.
    acc_ref[...] += jnp.dot(evt_ref[0], xm,
                            preferred_element_type=jnp.float32)      # (K, C)

    @pl.when(n == pl.num_programs(1) - 1)
    def _():
        t = jnp.maximum(t_ref[...], 1e-8)                            # (1, C) clamp as in torch
        coefs = jnp.exp(-evals_ref[0] * t)                           # (K, C)
        o_ref[0] = (coefs * acc_ref[...]).astype(o_ref.dtype)


def spectral_to_basis(x, mass3, evecsT_bf, evals3, t, tm):
    """x [B,Np,C] f32 -> scaled spectral coefficients [B,K,C] bf16."""
    B, Np, C = x.shape
    K = evals3.shape[1]
    return pl.pallas_call(
        _to_basis_kernel,
        out_shape=jax.ShapeDtypeStruct((B, K, C), jnp.bfloat16),
        grid_spec=pltpu.PrefetchScalarGridSpec(
            num_scalar_prefetch=0,
            grid=(B, Np // tm),
            in_specs=[
                pl.BlockSpec((1, tm, C), lambda b, n: (b, n, 0)),   # x
                pl.BlockSpec((1, tm, 1), lambda b, n: (b, n, 0)),   # mass
                pl.BlockSpec((1, K, tm), lambda b, n: (b, 0, n)),   # evecs^T (lane-dense)
                pl.BlockSpec((1, K, 1), lambda b, n: (b, 0, 0)),    # evals
                pl.BlockSpec((1, C), lambda b, n: (0, 0)),          # diffusion time
            ],
            out_specs=pl.BlockSpec((1, K, C), lambda b, n: (b, 0, 0)),
            scratch_shapes=[pltpu.VMEM((K, C), jnp.float32)],
        ),
        compiler_params=pltpu.CompilerParams(
            dimension_semantics=("parallel", "arbitrary")),
    )(x, mass3, evecsT_bf, evals3, t)
    # NOTE argument order matches in_specs / kernel signature (prev. bug fixed).


# ----------------------------------------------------------------------------
# Fused from-basis + gradient features + MiniMLP + residual
# grid = (B, N/TM, N/TK); the k axis streams evecs k-tiles and grad tiles,
# remapped over only the nonzero grad blocks via scalar prefetch.
# ----------------------------------------------------------------------------

def _grad_mlp_kernel(cnt_ref, idx_ref,                               # scalar prefetch (SMEM)
                     x_ref, evr_ref, evk_ref, spec_ref, gX_ref, gY_ref,
                     are_ref, aim_ref, w0a_ref, w0b_ref, w0c_ref, b0_ref,
                     w1_ref, b1_ref, w2_ref, b2_ref,
                     o_ref, gx_acc, gy_acc):
    b = pl.program_id(0)
    i = pl.program_id(1)
    k = pl.program_id(2)

    @pl.when(k == 0)
    def _():
        gx_acc[...] = jnp.zeros_like(gx_acc)
        gy_acc[...] = jnp.zeros_like(gy_acc)

    # Only the first cnt[b,i] k-steps carry real (nonzero) grad blocks; the
    # remaining steps revisit the last valid block (no new DMA) and are skipped.
    @pl.when(k < cnt_ref[b, i])
    def _():
        spec = spec_ref[0]                                            # (K, C) bf16
        xd_k = jnp.dot(evk_ref[0], spec,
                       preferred_element_type=jnp.float32
                       ).astype(jnp.bfloat16)                         # (tk, C)
        gx_acc[...] += jnp.dot(gX_ref[0], xd_k, preferred_element_type=jnp.float32)
        gy_acc[...] += jnp.dot(gY_ref[0], xd_k, preferred_element_type=jnp.float32)

    @pl.when(k == pl.num_programs(2) - 1)
    def _():
        bf = jnp.bfloat16
        gx = gx_acc[...]                                              # (tm, C) f32
        gy = gy_acc[...]
        gx_b = gx.astype(bf)
        gy_b = gy.astype(bf)

        # SpatialGradientFeatures (with gradient rotations); bf16 MXU, f32 acc.
        A_re = are_ref[...]
        A_im = aim_ref[...]
        b_real = (jnp.dot(gx_b, A_re, preferred_element_type=jnp.float32)
                  - jnp.dot(gy_b, A_im, preferred_element_type=jnp.float32))
        b_imag = (jnp.dot(gy_b, A_re, preferred_element_type=jnp.float32)
                  + jnp.dot(gx_b, A_im, preferred_element_type=jnp.float32))
        grad_feat = jnp.tanh(gx * b_real + gy * b_imag)               # f32 elementwise

        # Recompute this row tile's x_diffuse from the spectral coefficients.
        xd_row = jnp.dot(evr_ref[0], spec_ref[0],
                         preferred_element_type=jnp.float32)          # (tm, C)

        # MiniMLP([3C, C, C, C]); the concat is replaced by split-W0 sum.
        x = x_ref[0]                                                  # (tm, C) f32
        h = (jnp.dot(x.astype(bf), w0a_ref[...], preferred_element_type=jnp.float32)
             + jnp.dot(xd_row.astype(bf), w0b_ref[...], preferred_element_type=jnp.float32)
             + jnp.dot(grad_feat.astype(bf), w0c_ref[...], preferred_element_type=jnp.float32)
             + b0_ref[...])
        h = jnp.maximum(h, 0.0)
        h = jnp.maximum(jnp.dot(h.astype(bf), w1_ref[...],
                                preferred_element_type=jnp.float32) + b1_ref[...], 0.0)
        h = jnp.dot(h.astype(bf), w2_ref[...],
                    preferred_element_type=jnp.float32) + b2_ref[...]
        o_ref[0] = (h + x).astype(o_ref.dtype)                        # residual


def diffusion_block(x, mass3, evals3, evecsT_bf, evecs_bf, gX_bf, gY_bf,
                    blk_cnt, blk_idx, p, tm, tk):
    B, Np, C = x.shape
    K = evals3.shape[1]
    ni = Np // tm
    nk = Np // tk

    spec_bf = spectral_to_basis(x, mass3, evecsT_bf, evals3, p["time"], tm)

    bf = jnp.bfloat16
    A_re = p["A_re"].astype(bf)
    A_im = p["A_im"].astype(bf)
    W0a = p["W0"][:C].astype(bf)
    W0b = p["W0"][C:2 * C].astype(bf)
    W0c = p["W0"][2 * C:].astype(bf)
    W1 = p["W1"].astype(bf)
    W2 = p["W2"].astype(bf)

    return pl.pallas_call(
        _grad_mlp_kernel,
        out_shape=jax.ShapeDtypeStruct((B, Np, C), jnp.float32),
        grid_spec=pltpu.PrefetchScalarGridSpec(
            num_scalar_prefetch=2,                                     # blk_cnt, blk_idx
            grid=(B, ni, nk),
            in_specs=[
                pl.BlockSpec((1, tm, C), lambda b, i, k, cnt, idx: (b, i, 0)),   # x
                pl.BlockSpec((1, tm, K), lambda b, i, k, cnt, idx: (b, i, 0)),   # evecs row tile
                pl.BlockSpec((1, tk, K),
                             lambda b, i, k, cnt, idx: (b, idx[b, i, k], 0)),    # evecs k tile
                pl.BlockSpec((1, K, C), lambda b, i, k, cnt, idx: (b, 0, 0)),    # spectral coefs
                pl.BlockSpec((1, tm, tk),
                             lambda b, i, k, cnt, idx: (b, i, idx[b, i, k]),
                             pipeline_mode=pl.Buffered(3)),                       # gradX tile
                pl.BlockSpec((1, tm, tk),
                             lambda b, i, k, cnt, idx: (b, i, idx[b, i, k]),
                             pipeline_mode=pl.Buffered(3)),                       # gradY tile
                pl.BlockSpec((C, C), lambda b, i, k, cnt, idx: (0, 0)),          # A_re
                pl.BlockSpec((C, C), lambda b, i, k, cnt, idx: (0, 0)),          # A_im
                pl.BlockSpec((C, C), lambda b, i, k, cnt, idx: (0, 0)),          # W0a
                pl.BlockSpec((C, C), lambda b, i, k, cnt, idx: (0, 0)),          # W0b
                pl.BlockSpec((C, C), lambda b, i, k, cnt, idx: (0, 0)),          # W0c
                pl.BlockSpec((1, C), lambda b, i, k, cnt, idx: (0, 0)),          # b0
                pl.BlockSpec((C, C), lambda b, i, k, cnt, idx: (0, 0)),          # W1
                pl.BlockSpec((1, C), lambda b, i, k, cnt, idx: (0, 0)),          # b1
                pl.BlockSpec((C, C), lambda b, i, k, cnt, idx: (0, 0)),          # W2
                pl.BlockSpec((1, C), lambda b, i, k, cnt, idx: (0, 0)),          # b2
            ],
            out_specs=pl.BlockSpec((1, tm, C), lambda b, i, k, cnt, idx: (b, i, 0)),
            scratch_shapes=[pltpu.VMEM((tm, C), jnp.float32),
                            pltpu.VMEM((tm, C), jnp.float32)],
        ),
        compiler_params=pltpu.CompilerParams(
            dimension_semantics=("parallel", "parallel", "arbitrary"),
            # v5e's scoped-VMEM default is only 16 MiB; raise it explicitly so
            # 512-row tiles + 3-deep grad buffering stay portable (usage is a
            # few MiB, well under v7x's 64 MiB physical VMEM).
            vmem_limit_bytes=48 * 1024 * 1024),
    )(blk_cnt, blk_idx,
      x, evecs_bf, evecs_bf, spec_bf, gX_bf, gY_bf,
      A_re, A_im, W0a, W0b, W0c, p["b0"], W1, p["b1"], W2, p["b2"])


# ----------------------------------------------------------------------------
# Block-sparse schedule for the gradX/gradY contraction
# ----------------------------------------------------------------------------

def _grad_block_schedule(gradX, gradY, tm, tk):
    """Per (batch, row-tile): count of nonzero (tm,tk) grad blocks and the
    remapped k-block indices (nonzero blocks first, padding repeats the last
    valid block so the pipeline issues no new DMA for skipped steps)."""
    B, Np, _ = gradX.shape
    ni, nk = Np // tm, Np // tk

    def occ(g):
        return jnp.any(g.reshape(B, ni, tm, nk, tk) != 0, axis=(2, 4))

    occupied = jnp.logical_or(occ(gradX), occ(gradY))                  # [B, ni, nk]
    cnt = jnp.sum(occupied, axis=-1).astype(jnp.int32)                 # [B, ni]
    order = jnp.argsort(jnp.logical_not(occupied).astype(jnp.int32),
                        axis=-1, stable=True).astype(jnp.int32)        # occupied first
    kk = jnp.arange(nk, dtype=jnp.int32)
    last_valid = jnp.take_along_axis(order,
                                     jnp.maximum(cnt - 1, 0)[..., None], axis=-1)
    idx = jnp.where(kk[None, None, :] < cnt[..., None], order, last_valid)
    return cnt, idx.astype(jnp.int32)


# ----------------------------------------------------------------------------
# DiffusionNet forward (glue)
# ----------------------------------------------------------------------------

def diffusion_net_forward(x_in, mass, evals, evecs, gradX, gradY, params):
    B, N, _ = x_in.shape
    Np, tm, tk = _tile_and_pad(N)
    if Np != N:
        pad = Np - N
        x_in = jnp.pad(x_in, ((0, 0), (0, pad), (0, 0)))
        mass = jnp.pad(mass, ((0, 0), (0, pad)))
        evecs = jnp.pad(evecs, ((0, 0), (0, pad), (0, 0)))
        gradX = jnp.pad(gradX, ((0, 0), (0, pad), (0, pad)))
        gradY = jnp.pad(gradY, ((0, 0), (0, pad), (0, pad)))

    # One-time casts / transposes of the bandwidth-dominant operators.
    bf = jnp.bfloat16
    evecs_bf = evecs.astype(bf)                        # [B, Np, K]
    evecsT_bf = jnp.swapaxes(evecs, 1, 2).astype(bf)   # [B, K, Np] (lane-dense to-basis)
    gX_bf = gradX.astype(bf)
    gY_bf = gradY.astype(bf)
    # TODO(synk): v7x fp8(e4m3) / v5e-v6e int8(+per-row scale) grad operands not implemented.
    mass3 = mass[:, :, None]
    evals3 = evals[:, :, None]

    blk_cnt, blk_idx = _grad_block_schedule(gradX, gradY, tm, tk)

    x = linear(x_in, params["first_W"], params["first_b"], tm)
    for p in params["blocks"]:
        x = diffusion_block(x, mass3, evals3, evecsT_bf, evecs_bf, gX_bf, gY_bf,
                            blk_cnt, blk_idx, p, tm, tk)
    x = linear(x, params["last_W"], params["last_b"], tm)
    if Np != N:
        x = x[:, :N, :]
    # outputs_at == 'vertices', last_activation is None (module defaults).
    # TODO(synk): 'edges'/'faces'/'global_mean' gather branches not implemented.
    return x


# ----------------------------------------------------------------------------
# Deterministic parameter init (shapes from the module's __init__)
# ----------------------------------------------------------------------------

def init_params(key, C_in, C_out, C_width, N_block):
    def lin(k, fin, fout):
        k1, k2 = jax.random.split(k)
        bound = 1.0 / np.sqrt(fin)
        W = jax.random.uniform(k1, (fin, fout), jnp.float32, -bound, bound)
        b = jax.random.uniform(k2, (1, fout), jnp.float32, -bound, bound)
        return W, b

    ks = jax.random.split(key, 2 + N_block)
    first_W, first_b = lin(ks[0], C_in, C_width)
    last_W, last_b = lin(ks[1], C_width, C_out)
    blocks = []
    for i in range(N_block):
        bk = jax.random.split(ks[2 + i], 6)
        bound = 1.0 / np.sqrt(C_width)
        A_re = jax.random.uniform(bk[0], (C_width, C_width), jnp.float32, -bound, bound)
        A_im = jax.random.uniform(bk[1], (C_width, C_width), jnp.float32, -bound, bound)
        W0, b0 = lin(bk[2], 3 * C_width, C_width)
        W1, b1 = lin(bk[3], C_width, C_width)
        W2, b2 = lin(bk[4], C_width, C_width)
        t = jax.random.uniform(bk[5], (1, C_width), jnp.float32, 0.0, 0.1)
        blocks.append(dict(time=t, A_re=A_re, A_im=A_im,
                           W0=W0, b0=b0, W1=W1, b1=b1, W2=W2, b2=b2))
    return dict(first_W=first_W, first_b=first_b,
                last_W=last_W, last_b=last_b, blocks=blocks)


# ----------------------------------------------------------------------------
# Pure-JAX f32 reference (module semantics) for correctness check
# ----------------------------------------------------------------------------

def reference_forward(x_in, mass, evals, evecs, gradX, gradY, params):
    def lin(x, W, b):
        return x @ W + b

    x = lin(x_in, params["first_W"], params["first_b"])
    for p in params["blocks"]:
        t = jnp.maximum(p["time"], 1e-8)[0]                        # (C,)
        xw = x * mass[:, :, None]
        x_spec = jnp.einsum('bnk,bnc->bkc', evecs, xw)
        coefs = jnp.exp(-evals[:, :, None] * t[None, None, :])
        x_diff = jnp.einsum('bnk,bkc->bnc', evecs, coefs * x_spec)
        gx = jnp.einsum('bnm,bmc->bnc', gradX, x_diff)
        gy = jnp.einsum('bnm,bmc->bnc', gradY, x_diff)
        b_real = gx @ p["A_re"] - gy @ p["A_im"]
        b_imag = gy @ p["A_re"] + gx @ p["A_im"]
        gf = jnp.tanh(gx * b_real + gy * b_imag)
        feat = jnp.concatenate([x, x_diff, gf], axis=-1)
        h = jax.nn.relu(lin(feat, p["W0"], p["b0"]))
        h = jax.nn.relu(lin(h, p["W1"], p["b1"]))
        h = lin(h, p["W2"], p["b2"])
        x = h + x
    return lin(x, params["last_W"], params["last_b"])


# ----------------------------------------------------------------------------

if __name__ == "__main__":
    B, N, K = 2, 16, 8
    C_in, C_out, C_width, N_block = 4, 4, 32, 2

    key = jax.random.PRNGKey(0)
    k = jax.random.split(key, 8)
    x = jax.random.normal(k[0], (B, N, C_in), jnp.float32)
    mass = jax.random.uniform(k[1], (B, N), jnp.float32, 0.5, 1.5)
    evals = jnp.sort(jax.random.uniform(k[2], (B, K), jnp.float32, 0.0, 2.0), axis=-1)
    evecs = jax.random.normal(k[3], (B, N, K), jnp.float32) / np.sqrt(N)
    gradX = jax.random.normal(k[4], (B, N, N), jnp.float32) * 0.1
    gradY = jax.random.normal(k[5], (B, N, N), jnp.float32) * 0.1
    params = init_params(k[6], C_in, C_out, C_width, N_block)

    out = diffusion_net_forward(x, mass, evals, evecs, gradX, gradY, params)
    out = jax.block_until_ready(out)

    ref = reference_forward(x, mass, evals, evecs, gradX, gradY, params)
    # Tolerance reflects bf16 streaming of evecs/grad operators and MLP weights
    # (f32 accumulation everywhere); structural errors would be O(1) or NaN.
    np.testing.assert_allclose(np.asarray(out), np.asarray(ref), rtol=5e-2, atol=5e-2)

    print("KERNEL_OK")
</pallas_src>

<mosaic_0001>
module attributes {stable_mosaic.version = 11 : i64} {
  func.func @_linear_kernel(%arg0: i32, %arg1: i32, %arg2: memref<1x16x4xf32, #tpu.memory_space<vmem>>, %arg3: memref<4x32xf32, #tpu.memory_space<vmem>>, %arg4: memref<1x32xf32, #tpu.memory_space<vmem>>, %arg5: memref<1x16x32xf32, #tpu.memory_space<vmem>>) attributes {dimension_semantics = [#tpu.dimension_semantics<parallel>, #tpu.dimension_semantics<parallel>], iteration_bounds = array<i64: 2, 1>, scalar_prefetch = 0 : i64, scratch_operands = 0 : i64, tpu.core_type = #tpu.core_type<tc>, window_params = [{transform_indices = @transform_0, window_bounds = array<i64: 1, 16, 4>}, {pipeline_mode = #tpu.pipeline_mode<synchronous>, transform_indices = @transform_1, window_bounds = array<i64: 4, 32>}, {pipeline_mode = #tpu.pipeline_mode<synchronous>, transform_indices = @transform_2, window_bounds = array<i64: 1, 32>}, {transform_indices = @transform_3, window_bounds = array<i64: 1, 16, 32>}]} {
    %c0 = arith.constant 0 : index
    %c0_0 = arith.constant 0 : index
    %c0_1 = arith.constant 0 : index
    %0 = vector.load %arg2[%c0, %c0_0, %c0_1] : memref<1x16x4xf32, #tpu.memory_space<vmem>>, vector<1x16x4xf32>
    %1 = vector.shape_cast %0 : vector<1x16x4xf32> to vector<16x4xf32>
    %c0_2 = arith.constant 0 : index
    %c0_3 = arith.constant 0 : index
    %2 = vector.load %arg3[%c0_2, %c0_3] : memref<4x32xf32, #tpu.memory_space<vmem>>, vector<4x32xf32>
    %cst = arith.constant dense<0.000000e+00> : vector<16x32xf32>
    %3 = tpu.matmul %1, %2, %cst {dimension_numbers = #tpu.dot_dimension_numbers<[1], [0], [0], [1], [0, 0, 1, 1], [], []>} : vector<16x4xf32>, vector<4x32xf32>, vector<16x32xf32> -> vector<16x32xf32>
    %c0_4 = arith.constant 0 : index
    %c0_5 = arith.constant 0 : index
    %4 = vector.load %arg4[%c0_4, %c0_5] : memref<1x32xf32, #tpu.memory_space<vmem>>, vector<1x32xf32>
    %5 = vector.broadcast %4 : vector<1x32xf32> to vector<16x32xf32>
    %6 = arith.addf %3, %5 : vector<16x32xf32>
    %c0_6 = arith.constant 0 : index
    %c0_7 = arith.constant 0 : index
    %c0_8 = arith.constant 0 : index
    %7 = vector.load %arg5[%c0_6, %c0_7, %c0_8] : memref<1x16x32xf32, #tpu.memory_space<vmem>>, vector<1x16x32xf32>
    %8 = vector.shape_cast %7 : vector<1x16x32xf32> to vector<16x32xf32>
    %9 = vector.shape_cast %6 : vector<16x32xf32> to vector<1x16x32xf32>
    tpu.vector_store %arg5[%c0_6, %c0_7, %c0_8], %9 {strides = array<i32>} : memref<1x16x32xf32, #tpu.memory_space<vmem>>, vector<1x16x32xf32>,
    return
  }
  func.func @transform_0(%arg0: i32, %arg1: i32) -> (i32, i32, i32) {
    %c0_i32 = arith.constant 0 : i32
    %c0_i32_0 = arith.constant 0 : i32
    return %arg0, %arg1, %c0_i32 : i32, i32, i32
  }
  func.func @transform_1(%arg0: i32, %arg1: i32) -> (i32, i32) {
    %c0_i32 = arith.constant 0 : i32
    %c0_i32_0 = arith.constant 0 : i32
    %c0_i32_1 = arith.constant 0 : i32
    return %c0_i32, %c0_i32_0 : i32, i32
  }
  func.func @transform_2(%arg0: i32, %arg1: i32) -> (i32, i32) {
    %c0_i32 = arith.constant 0 : i32
    %c0_i32_0 = arith.constant 0 : i32
    %c0_i32_1 = arith.constant 0 : i32
    return %c0_i32, %c0_i32_0 : i32, i32
  }
  func.func @transform_3(%arg0: i32, %arg1: i32) -> (i32, i32, i32) {
    %c0_i32 = arith.constant 0 : i32
    %c0_i32_0 = arith.constant 0 : i32
    return %arg0, %arg1, %c0_i32 : i32, i32, i32
  }
}

</mosaic_0001>

<bundles_post_ra>
// kernel: tpu_custom_call.1
= control target key start
LH: loop header
LB: loop body
LE: loop exit
PB: predicated region body
PF: predicated region fallthrough
CT: control target
= control target key end

     0   :  { %8 = vsyncpa [#allocation3], 0  ;;  %s702_s0 = inlined_call_operand.vmem [shape: f32[2,16,4], index: 0, kind: input, shape index: {}]   ;;  %s703_s1 = inlined_call_operand.vmem [shape: f32[4,32], index: 1, kind: input, shape index: {}]   ;;  %s704_s2 = inlined_call_operand.vmem [shape: f32[1,32], index: 2, kind: input, shape index: {}]   ;;  %s705_s3 = inlined_call_operand.hbm [shape: f32[2,16,32], index: 3, kind: output, shape index: {}]  }
   0x1   :  { %10 = vsyncpa [#allocation3 + $0x1], 0  ;;  %s581_s12 = smov 0   ;;  %s583_s13 = smov 0  }
   0x2   :  { %s585_s14 = smov 0   ;;  %s587_s15 = smov 0  }
   0x3   :  { %s589_s16 = smov 0   ;;  %s591_s17 = smov 0  }
   0x4 LB: > { %s394_s18 = sadd.s32 4294967295, %s556_s17   ;;  %s395_s19 = sadd.s32 4294967294, %s556_s17   ;;  %s556_s17 = sphi %s591_s17, %s16_s17   ;;  %s552_s16 = sphi %s589_s16, %s712_s16   ;;  %s548_s15 = sphi %s587_s15, %s711_s15   ;;  %s544_s14 = sphi %s585_s14, %s710_s14   ;;  %s540_s13 = sphi %s583_s13, %s709_s13   ;;  %s536_s12 = sphi %s581_s12, %s708_s12  }
   0x5   : > { %s28_s20 = sadd.s32 1, %s552_s16  ;;  %s107_s21 = sadd.s32 1, %s544_s14 }
   0x6   : > { %p30_p0 = scmp.ge.s32.totalorder %s28_s20, 2  ;;  %p117_p1 = scmp.ne.s32.totalorder %s544_s14, %s540_s13 }
   0x7   : > { %p118_p2 = scmp.eq.s32.totalorder %s394_s18, 1  ;;  %p123_p3 = scmp.ne.s32.totalorder %s540_s13, %s536_s12 }
   0x8   : > { %s714_s20 = smov (%p30_p0, %s28_s20), 0  ;;  %p124_p5 = scmp.eq.s32.totalorder %s395_s19, 1 }
   0x9   : > { %p621_p4 = por %p118_p2, %p117_p1  ;;  %s102_s23 = ssub.s32 %s552_s16, %s714_s20 }
   0xa   : > { %p398_p6 = scmp.ge.s32.totalorder %s556_s17, 1  ;;  %p105_p7 = scmp.eq.s32.totalorder %s102_s23, 0 }
   0xb   : > { %p628_p8 = por %p124_p5, %p123_p3  ;;  %p161_p9 = scmp.lt.s32.totalorder %s556_s17, 3 }
   0xc   : > { %s634_s25 = scalar_select %p105_p7, %s544_s14, %s107_s21  }
   0xd   : > { %p162_p10 = pnand %p398_p6, %p161_p9 }
   0xe   : > { %v202_v0 = vld [vmem:[%s703_s1] sm:$0xf] (!%p162_p10)  ;;  %vm217_vm0 = vcmask (!%p162_p10), 1043456   ;;  %p190_p11 = scmp.lt.s32.totalorder (!%p162_p10), %s548_s15, 1  ;;  %vm210_vm1 = vcmask (!%p162_p10), 31744   ;;  %s186_s6 = sand.u32 (!%p162_p10), 1, %s540_s13  }
   0xf   : > { %165 = sbr.rel (%p162_p10) target bundleno = 258 (0x102), region = 32  ;;  %416 = vmatprep.subr.msk.mxu0 (!%p162_p10), %vm217_vm0, %v202_v0  ;;  %s399_s7 = sshll.u32 (!%p162_p10), %s186_s6, 4  ;;  %v402_v3 = vld [vmem:[%s704_s2] ss:$0 sm:$0xff] (!%p162_p10)  ;;  %vm296_vm2 = vcmask (!%p162_p10), 261120  }
  0x10   : > { %417 = vmatpush3.msk.msra.mxu0 (!%p162_p10), %vm217_vm0, %v202_v0  ;;  %s188_s10 = scalar_lea.vmem (!%p162_p10), [#allocation2], %s399_s7  ;;  %s412_s18 = sshll.u32 (!%p162_p10), %s548_s15, 8 }
  0x11   : > { %s315_s11 = sshll.u32 (!%p162_p10), %s188_s10, 4  ;;  %s654_s23 = scalar_lea.hbm (!%p162_p10), %s705_s3, %s412_s18  ;;  %s649_s11 = int_to_ptr.vmem [resolvable:$true] %s315_s11 }
  0x12   : > { %s656_s26 = scalar_lea.sflag (!%p162_p10), [#allocation3], %s186_s6  ;;  %s558_s27 = smov (!%p162_p10), [#allocation2]  }
  0x16   : > { %s191_s28 = scalar_select %p190_p11, %s548_s15, 1 }
  0x17   : > { %s478_s15 = scalar_lea.vmem %s649_s11, 256 }
  0x18   : > { %s411_s29 = sshll.u32 %s191_s28, 4  ;;  %p479_p12 = scmp.ne.s32.totalorder %s649_s11, %s478_s15 }
  0x19   : > { %s197_s5 = scalar_lea.vmem %s702_s0, %s411_s29  ;;  %s482_s28 = sshll.u32 %s558_s27, 4  ;;  %s483_s28 = int_to_ptr.vmem [resolvable:$false] %s482_s28 }
  0x1a   : > { %v200_v1 = vld [vmem:[%s197_s5] sm:$0xff]  ;;  %v201_v2 = vld [vmem:[%s197_s5 + $0x8] sm:$0xff]  ;;  %p480_p13 = pnand %p479_p12, %p621_p4  ;;  %s484_s29 = scalar_lea.vmem %s483_s28, 512 }
  0x1b   : > { %418 = vmatprep.mubr.msk.f32.mxu0 %vm210_vm1, %v200_v1  ;;  %p485_p1 = scmp.lt.s32.totalorder %s649_s11, %s483_s28  ;;  %p486_p2 = scmp.lt.s32.totalorder %s484_s29, %s478_s15 }
  0x1c   : > { %419 = vmatmul.mubr.msk.f32.vlgmr.msra.gmra.mrb[0].mxu0 %vm210_vm1, %v201_v2  ;;  %p481_p0 = pneg %p480_p13 }
  0x1d   : > { %p487_p3 = por %p486_p2, %p485_p1 }
  0x1f   : > { %p488_p5 = pnand %p487_p3, %p481_p0 }
  0xef   : > { %v420_v4 = vpop.f32.mrb[0].mxu0 }
  0xf0   : > { %v293_v5 = vadd.f32 %v420_v4, %v402_v3  ;;  %v287_v6 = vpop.f32.mrb[1].mxu0 }
  0xf1   : > { %v288_v7 = vadd.f32 %v402_v3, %v287_v6 }
  0xf2   : > { %298 = vst.msk [vmem:[%s188_s10 + $0x8] sm:$0xff] %vm296_vm2, %v293_v5 }
  0xf3   : > { %297 = vst.msk [vmem:[%s188_s10] sm:$0xff] %vm296_vm2, %v288_v7 }
  0xf4   : > { %491 = shalt.err (!%p488_p5)
}
  0xf5   : > { %s492_s30 = scalar_lea.hbm %s654_s23, 256  ;;  %s496_s6 = scalar_lea.hbm %s705_s3, 512 }
  0xf6   : > { %p493_p6 = scmp.ne.s32.totalorder %s654_s23, %s492_s30  ;;  %p497_p10 = scmp.lt.u32.totalorder %s654_s23, %s705_s3 }
  0xf7   : > { %p498_p11 = scmp.lt.u32.totalorder %s496_s6, %s492_s30  ;;  %p500_p13 = scmp.lt.u32.totalorder %s492_s30, %s654_s23 }
  0xf8   : > { %p494_p7 = pnand %p493_p6, %p621_p4 }
  0xf9   : > { %p499_p12 = por %p498_p11, %p497_p10 }
  0xfa   : > { %p495_p9 = pneg %p494_p7 }
  0xfb   : > { %p501_p0 = por %p500_p13, %p499_p12 }
  0xfd   : > { %p502_p1 = pnand %p501_p0, %p495_p9 }
  0xff   : > { %505 = shalt.err (!%p502_p1)
}
 0x100   : > { %s559_s9 = smov 128   ;;  %s560_s10 = smov 8  }
 0x101   : > { %421 = dma.vmem_to_hbm [thread:$0]  (%p621_p4), %s649_s11, 256, %s654_s23, %s656_s26, %s559_s9, %s559_s9, %s560_s10  }
 0x102 PF: > { %p427_p2 = scmp.ge.s32.totalorder %s556_s17, 2  ;;  %s330_s18 = sand.u32 1, %s536_s12  }
 0x103   : > { %s331_s19 = scalar_lea.sflag [#allocation3], %s330_s18 }
 0x104   : > { %p424_p3 = pnand %p427_p2, %p628_p8 }
 0x106   : > { %531 = dma.done.wait (!%p424_p3), %s331_s19, 256  }
 0x107   : > { %533 = vsyncadd (!%p424_p3), %s331_s19, 4294967040  ;;  %s16_s17 = sadd.s32 1, %s556_s17   ;;  %s708_s12 = smov %s540_s13 }
 0x108   : > { %p13_p5 = scmp.ge.s32.totalorder %s16_s17, 4   ;;  %s709_s13 = smov %s544_s14 }
 0x109   : > { %s710_s14 = smov %s634_s25  ;;  %s711_s15 = smov %s552_s16 }
 0x10a   : > { %s712_s16 = smov %s714_s20  ;;  %15 = sbr.rel (!%p13_p5) target bundleno = 4 (0x4), region = 67 }
 0x111   :  { %336 = vsyncpa [#allocation3], 1 }
 0x112   :  { %338 = vsyncpa [#allocation3 + $0x1], 1 }

</bundles_post_ra>
